<compile_context>
chip_gen: v7x
topology: tpu7x:2x2x1
jax: 0.10.0
libtpu: 0.0.40
codegen_flags: <defaults>
</compile_context>

<pallas_src>
import numpy as np
import jax
import jax.numpy as jnp
from jax.experimental import pallas as pl
from jax.experimental.pallas import tpu as pltpu


# ---------------------------------------------------------------------------
# Tiling policy
# ---------------------------------------------------------------------------
_TARGET_GRID_STEPS = 8           # aim for >= 8 pipelined steps along N
_MIN_TILE_BYTES = 2 << 20        # ~2 MiB tiles sit at the 85% HBM-roofline knee
_D_TILE_TARGET_BYTES = 4 << 20   # per-tile target for the D-tiled two-pass path
_DEFAULT_SMALL_INPUT_FALLBACK = 1 << 20  # below this, XLA fusion beats dispatch


def _sublane(itemsize):
    return {4: 8, 2: 16, 1: 32}.get(itemsize, 8)


def _vmem_budgets():
    """(tile_budget_bytes, scoped_vmem_limit_bytes) derived from the local chip."""
    try:
        vmem = int(pltpu.get_tpu_info().vmem_capacity_bytes)
    except Exception:
        vmem = 64 * 1024 * 1024  # conservative default: v7x has 64 MiB per TC
    # Scoped limit: half of physical VMEM (headroom for Mosaic scratch,
    # semaphores, padded remainder blocks).  Tile budget: 3/4 of that for the
    # double-buffered (input + output) working set.
    limit = min(vmem // 2, 64 * 1024 * 1024)
    tile_budget = (limit * 3) // 4
    return tile_budget, limit


def _pick_block_rows(n, d, itemsize, tile_budget, max_block_rows=None):
    """TN for the full-D path, or None if even the minimum legal tile overflows."""
    sub = _sublane(itemsize)
    bytes_per_row = max(1, d * itemsize)
    # Per grid step: 2 pipeline buffers x (input tile + output tile).
    tn_fit = tile_budget // (4 * bytes_per_row)
    if max_block_rows is not None:
        tn_fit = min(tn_fit, max_block_rows)
    if tn_fit < min(sub, n):
        return None                      # needs D tiling (two-pass kernel)
    if n <= sub:
        return n                         # single full-extent block; can't tile finer
    # >= _TARGET_GRID_STEPS pipelined steps, but keep tiles >= _MIN_TILE_BYTES.
    tn = max(-(-n // _TARGET_GRID_STEPS), -(-_MIN_TILE_BYTES // bytes_per_row), sub)
    tn = min(tn, tn_fit)
    tn = max(sub, (tn // sub) * sub)
    if tn >= n:
        return n
    # Best effort: make the grid length even so v7x's two TensorCores balance.
    steps = -(-n // tn)
    if steps > 1 and steps % 2 == 1:
        for target_steps in (steps + 1, steps + 3):
            cand = max(sub, ((-(-n // target_steps)) // sub) * sub)
            if cand <= tn_fit and (-(-n // cand)) % 2 == 0:
                tn = cand
                break
    return tn


# ---------------------------------------------------------------------------
# Kernels
# ---------------------------------------------------------------------------
def _ls1_full_d_kernel(x_ref, xq_ref):
    # x_ref / xq_ref: (TN, D) tile, D = full per-sample size.
    x = x_ref[...]
    d = x.shape[1]
    row_sum = jnp.sum(jnp.abs(x), axis=1, keepdims=True, dtype=jnp.float32)  # (TN, 1)
    v1 = (row_sum * jnp.float32(1.0 / d)).astype(x.dtype)                    # (TN, 1)
    # sign(x) * v1 with torch.sign semantics (sign(0) == 0), written as two
    # compares + two selects: no extra multiply / f32 upconvert on the VPU.
    xq_ref[...] = jnp.where(
        x > 0, v1, jnp.where(x < 0, -v1, jnp.zeros_like(x))
    ).astype(xq_ref.dtype)


def _make_rowsum_kernel(d_total, td):
    needs_mask = (d_total % td) != 0

    def kernel(x_ref, sum_ref):
        j = pl.program_id(1)

        @pl.when(j == 0)
        def _():
            sum_ref[...] = jnp.zeros_like(sum_ref)

        x = x_ref[...]
        absx = jnp.abs(x)
        if needs_mask:
            # Padded tail columns along the reduction axis hold garbage; mask them.
            col = jax.lax.broadcasted_iota(jnp.int32, x.shape, 1) + j * td
            absx = jnp.where(col < d_total, absx, jnp.zeros_like(absx))
        sum_ref[...] += jnp.sum(absx, axis=1, keepdims=True, dtype=jnp.float32)

    return kernel


def _make_apply_kernel(d_total):
    inv_d = np.float32(1.0 / d_total)

    def kernel(x_ref, sum_ref, xq_ref):
        x = x_ref[...]
        v1 = (sum_ref[...] * inv_d).astype(x.dtype)   # (TN, 1)
        xq_ref[...] = jnp.where(
            x > 0, v1, jnp.where(x < 0, -v1, jnp.zeros_like(x))
        ).astype(xq_ref.dtype)

    return kernel


# ---------------------------------------------------------------------------
# pallas_call wrappers
# ---------------------------------------------------------------------------
def _ls1_full_d(x2, tn, vmem_limit):
    n, d = x2.shape
    return pl.pallas_call(
        _ls1_full_d_kernel,
        out_shape=jax.ShapeDtypeStruct((n, d), x2.dtype),
        grid_spec=pltpu.PrefetchScalarGridSpec(
            num_scalar_prefetch=0,
            grid=(pl.cdiv(n, tn),),
            in_specs=[pl.BlockSpec((tn, d), lambda i: (i, 0))],
            out_specs=pl.BlockSpec((tn, d), lambda i: (i, 0)),
        ),
        compiler_params=pltpu.CompilerParams(
            dimension_semantics=("parallel",),
            vmem_limit_bytes=vmem_limit,
        ),
    )(x2)


def _ls1_d_tiled(x2, itemsize, tile_budget, vmem_limit):
    """Two-pass path for activations whose full-D row tile overflows VMEM."""
    n, d = x2.shape
    sub = _sublane(itemsize)
    tn = n if n <= 8 * sub else 8 * sub
    # Lane tile along D: multiple of 128, sized so the apply pass's
    # double-buffered x-in + x-out tiles fit the budget (target ~4 MiB tiles).
    td_fit = max(128, tile_budget // (4 * tn * itemsize))
    td_target = max(128, _D_TILE_TARGET_BYTES // (tn * itemsize))
    td = max(128, (min(td_fit, td_target) // 128) * 128)
    td = min(td, d) if d >= 128 else d
    grid = (pl.cdiv(n, tn), pl.cdiv(d, td))

    # Pass 1: per-row sum(|x|), reduction axis ("arbitrary") last.
    row_sum = pl.pallas_call(
        _make_rowsum_kernel(d, td),
        out_shape=jax.ShapeDtypeStruct((n, 1), jnp.float32),
        grid_spec=pltpu.PrefetchScalarGridSpec(
            num_scalar_prefetch=0,
            grid=grid,
            in_specs=[pl.BlockSpec((tn, td), lambda i, j: (i, j))],
            out_specs=pl.BlockSpec((tn, 1), lambda i, j: (i, 0)),
        ),
        compiler_params=pltpu.CompilerParams(
            dimension_semantics=("parallel", "arbitrary"),
            vmem_limit_bytes=vmem_limit,
        ),
    )(x2)

    # Pass 2: elementwise sign(x) * (row_sum / D), fully parallel.
    return pl.pallas_call(
        _make_apply_kernel(d),
        out_shape=jax.ShapeDtypeStruct((n, d), x2.dtype),
        grid_spec=pltpu.PrefetchScalarGridSpec(
            num_scalar_prefetch=0,
            grid=grid,
            in_specs=[pl.BlockSpec((tn, td), lambda i, j: (i, j)),
                      pl.BlockSpec((tn, 1), lambda i, j: (i, 0))],
            out_specs=pl.BlockSpec((tn, td), lambda i, j: (i, j)),
        ),
        compiler_params=pltpu.CompilerParams(
            dimension_semantics=("parallel", "parallel"),
            vmem_limit_bytes=vmem_limit,
        ),
    )(x2, row_sum)


def _reference_ls1(x):
    # Pure-JAX reference of quantizer_ls_1 forward (moving_average_mode='off').
    n = x.shape[0]
    xf = x.reshape(n, -1).astype(jnp.float32)
    v1 = jnp.mean(jnp.abs(xf), axis=1, keepdims=True)
    return (jnp.sign(xf) * v1).reshape(x.shape).astype(x.dtype)


def activation_quantizer_ls1(x, *, max_block_rows=None,
                             small_input_fallback_bytes=_DEFAULT_SMALL_INPUT_FALLBACK,
                             vmem_tile_budget_bytes=None):
    """Pallas forward of ActivationQuantizerLS1 (moving_average_mode='off')."""
    n = x.shape[0]
    d = int(np.prod(x.shape[1:])) if x.ndim > 1 else 1
    itemsize = jnp.dtype(x.dtype).itemsize

    # Tiny activations: a standalone pallas_call is dominated by dispatch cost;
    # let XLA fuse the reduction + rescale instead (call sites should batch
    # multiple layers' activations to hit the kernel path).
    if n * d * itemsize < small_input_fallback_bytes:
        return _reference_ls1(x)

    tile_budget, vmem_limit = _vmem_budgets()
    if vmem_tile_budget_bytes is not None:
        tile_budget = vmem_tile_budget_bytes

    x2 = x.reshape(n, d)
    tn = _pick_block_rows(n, d, itemsize, tile_budget, max_block_rows)
    if tn is not None:
        xq = _ls1_full_d(x2, tn, vmem_limit)
    else:
        # Even the minimum legal (sublane x D) tile overflows VMEM: D-tiled
        # two-pass kernel (row-sum reduction, then elementwise apply).
        xq = _ls1_d_tiled(x2, itemsize, tile_budget, vmem_limit)
    return xq.reshape(x.shape)


if __name__ == "__main__":
    # TODO(synk): moving-average ('eval_only'/'train_and_eval') bookkeeping is
    # stateful training-time tracking; only the default 'off' forward path is
    # implemented here (identical x_q in train and eval for 'off').
    key = jax.random.PRNGKey(0)

    # 1) Small NCHW activation (module's typical conv input); force the Pallas
    #    path (inputs this tiny normally take the fused-XLA fallback).
    x = jax.random.normal(key, (2, 4, 16, 16), dtype=jnp.float32)
    x_q = jax.block_until_ready(
        activation_quantizer_ls1(x, small_input_fallback_bytes=0))
    np.testing.assert_allclose(np.asarray(x_q), np.asarray(_reference_ls1(x)),
                               rtol=1e-5, atol=1e-6)

    # 2) Tiled / pipelined full-D path (grid > 1, even step count).
    x2 = jax.random.normal(jax.random.PRNGKey(1), (16, 4, 16, 16), dtype=jnp.float32)
    x2_q = jax.block_until_ready(
        activation_quantizer_ls1(x2, max_block_rows=8, small_input_fallback_bytes=0))
    np.testing.assert_allclose(np.asarray(x2_q), np.asarray(_reference_ls1(x2)),
                               rtol=1e-5, atol=1e-6)

    # 3) Two-pass D-tiled path (forced via a tiny tile budget); D = 9000 also
    #    exercises the tail-column masking in the row-sum reduction pass.
    x3 = jax.random.normal(jax.random.PRNGKey(2), (8, 10, 30, 30), dtype=jnp.float32)
    x3_q = jax.block_until_ready(
        activation_quantizer_ls1(x3, small_input_fallback_bytes=0,
                                 vmem_tile_budget_bytes=256 * 1024))
    np.testing.assert_allclose(np.asarray(x3_q), np.asarray(_reference_ls1(x3)),
                               rtol=1e-5, atol=1e-6)

    # 4) Default call path (tiny input -> fused-XLA fallback), correctness only.
    x4_q = jax.block_until_ready(activation_quantizer_ls1(x))
    np.testing.assert_allclose(np.asarray(x4_q), np.asarray(_reference_ls1(x)),
                               rtol=1e-5, atol=1e-6)

    print("KERNEL_OK")
</pallas_src>

<mosaic_0001>
module attributes {stable_mosaic.version = 11 : i64} {
  func.func @_ls1_full_d_kernel(%arg0: i32, %arg1: memref<2x1024xf32, #tpu.memory_space<vmem>>, %arg2: memref<2x1024xf32, #tpu.memory_space<vmem>>) attributes {dimension_semantics = [#tpu.dimension_semantics<parallel>], iteration_bounds = array<i64: 1>, scalar_prefetch = 0 : i64, scratch_operands = 0 : i64, tpu.core_type = #tpu.core_type<tc>, window_params = [{transform_indices = @transform_0, window_bounds = array<i64: 2, 1024>}, {transform_indices = @transform_1, window_bounds = array<i64: 2, 1024>}]} {
    %c0 = arith.constant 0 : index
    %c0_0 = arith.constant 0 : index
    %0 = vector.load %arg1[%c0, %c0_0] : memref<2x1024xf32, #tpu.memory_space<vmem>>, vector<2x1024xf32>
    %1 = math.absf %0 : vector<2x1024xf32>
    %cst = arith.constant dense<0.000000e+00> : vector<2xf32>
    %2 = vector.multi_reduction <add>, %1, %cst [1] : vector<2x1024xf32> to vector<2xf32>
    %3 = vector.shape_cast %2 : vector<2xf32> to vector<2x1xf32>
    %cst_1 = arith.constant 9.765625E-4 : f32
    %4 = vector.broadcast %cst_1 : f32 to vector<2x1xf32>
    %5 = arith.mulf %3, %4 : vector<2x1xf32>
    %cst_2 = arith.constant 0.000000e+00 : f32
    %6 = vector.broadcast %cst_2 : f32 to vector<2x1024xf32>
    %7 = arith.cmpf ogt, %0, %6 : vector<2x1024xf32>
    %cst_3 = arith.constant 0.000000e+00 : f32
    %8 = vector.broadcast %cst_3 : f32 to vector<2x1024xf32>
    %9 = arith.cmpf olt, %0, %8 : vector<2x1024xf32>
    %cst_4 = arith.constant 0.000000e+00 : f32
    %10 = vector.broadcast %cst_4 : f32 to vector<2x1xf32>
    %11 = arith.subf %10, %5 : vector<2x1xf32>
    %cst_5 = arith.constant 0.000000e+00 : f32
    %12 = vector.broadcast %cst_5 : f32 to vector<2x1024xf32>
    %13 = vector.shape_cast %11 : vector<2x1xf32> to vector<2x1xf32>
    %14 = vector.broadcast %13 : vector<2x1xf32> to vector<2x1024xf32>
    %15 = arith.select %9, %14, %12 : vector<2x1024xi1>, vector<2x1024xf32>
    %16 = vector.shape_cast %5 : vector<2x1xf32> to vector<2x1xf32>
    %17 = vector.broadcast %16 : vector<2x1xf32> to vector<2x1024xf32>
    %18 = arith.select %7, %17, %15 : vector<2x1024xi1>, vector<2x1024xf32>
    %c0_6 = arith.constant 0 : index
    %c0_7 = arith.constant 0 : index
    %19 = vector.load %arg2[%c0_6, %c0_7] : memref<2x1024xf32, #tpu.memory_space<vmem>>, vector<2x1024xf32>
    tpu.vector_store %arg2[%c0_6, %c0_7], %18 {strides = array<i32>} : memref<2x1024xf32, #tpu.memory_space<vmem>>, vector<2x1024xf32>,
    return
  }
  func.func @transform_0(%arg0: i32) -> (i32, i32) {
    %c0_i32 = arith.constant 0 : i32
    %c0_i32_0 = arith.constant 0 : i32
    return %arg0, %c0_i32 : i32, i32
  }
  func.func @transform_1(%arg0: i32) -> (i32, i32) {
    %c0_i32 = arith.constant 0 : i32
    %c0_i32_0 = arith.constant 0 : i32
    return %arg0, %c0_i32 : i32, i32
  }
}

</mosaic_0001>

<bundles_post_ra>
// kernel: tpu_custom_call.1
= control target key start
LH: loop header
LB: loop body
LE: loop exit
PB: predicated region body
PF: predicated region fallthrough
CT: control target
= control target key end

     0   :  { %6 = vsyncpa [#allocation3], 0  ;;  %s230_s0 = inlined_call_operand.hbm [shape: f32[2,1024], index: 0, kind: input, shape index: {}]   ;;  %s231_s1 = inlined_call_operand.hbm [shape: f32[2,1024], index: 1, kind: output, shape index: {}]  }
   0x1   :  { %7 = vsyncpa [#allocation4], 0  ;;  %s184_s6 = smov [#allocation2]   ;;  %s136_s10 = scalar_lea.hbm %s230_s0, 256 }
   0x2   :  { %s14_s7 = sshll.u32 %s184_s6, 4  ;;  %p137_p0 = scmp.ne.s32.totalorder %s230_s0, %s136_s10  ;;  %s15_s7 = int_to_ptr.vmem [resolvable:$true] %s14_s7 }
   0x3   :  { %p140_p1 = scmp.lt.u32.totalorder %s136_s10, %s230_s0 }
   0x5   :  { %p142_p2 = pnand %p140_p1, %p137_p0 }
   0x7   :  { %145 = shalt.err (!%p142_p2)
}
   0x8   :  { %s146_s15 = scalar_lea.vmem %s15_s7, 256  ;;  %p151_p4 = scmp.lt.s32.totalorder %s15_s7, %s15_s7 }
   0x9   :  { %p147_p3 = scmp.ne.s32.totalorder %s15_s7, %s146_s15  ;;  %p152_p5 = scmp.lt.s32.totalorder %s146_s15, %s146_s15 }
   0xb   :  { %p153_p6 = por %p152_p5, %p151_p4 }
   0xd   :  { %p154_p7 = pnand %p153_p6, %p147_p3 }
   0xf   :  { %157 = shalt.err (!%p154_p7)
}
  0x10   :  { %17 = dma.hbm_to_vmem [thread:$0]  %s230_s0, 256, %s15_s7, [#allocation3]  }
  0x11   :  { %180 = dma.done.wait [#allocation3], 256  }
  0x12   :  { %181 = vsyncadd [#allocation3], 4294967040  ;;  %v31_v0 = vlaneseq  ;;  %v185_v1 = vmov 1983009808   ;;  %v21_v6 = vld [vmem:[#allocation2] sm:$0xff]  ;;  %v22_v7 = vld [vmem:[#allocation2 + $0x8] sm:$0xff] }
  0x13   :  { %v29_v2 = vunpack.c.l.s4 %v185_v1  ;;  %v23_v8 = vand.u32 2147483647, %v21_v6  ;;  %v24_v9 = vand.u32 2147483647, %v22_v7  ;;  %vm69_vm0 = vcmask 1041408   ;;  %s187_s0 = smov [#allocation5]  }
  0x14   :  { %v32_v3 = vshrl.u32 %v31_v0, 7  ;;  %v186_v35 = vmov 269488144   ;;  %vm90_vm1 = vcmp.lt.f32.partialorder %v21_v6, 0.0  ;;  %vm91_vm2 = vcmp.lt.f32.partialorder %v22_v7, 0.0  ;;  %s123_s18 = sshll.u32 %s187_s0, 4  ;;  %s124_s18 = int_to_ptr.vmem [resolvable:$true] %s123_s18 }
  0x15   :  { %v30_v4 = vunpack.c.0.s8 %v29_v2  ;;  %v27_v10 = vcombine.high %v23_v8, %v23_v8  ;;  %v44_v14 = vcombine.high %v24_v9, %v24_v9  ;;  %v95_v36 = vunpack.c.l.s4 %v186_v35  ;;  %s158_s19 = scalar_lea.vmem %s124_s18, 256  ;;  %p163_p9 = scmp.lt.s32.totalorder %s124_s18, %s124_s18 }
  0x16   :  { %vm88_vm3 = vcmp.gt.f32.partialorder %v21_v6, 0.0  ;;  %vm89_vm4 = vcmp.gt.f32.partialorder %v22_v7, 0.0  ;;  %p159_p8 = scmp.ne.s32.totalorder %s124_s18, %s158_s19  ;;  %p164_p10 = scmp.lt.s32.totalorder %s158_s19, %s158_s19 }
  0x17   :  { %v33_v5 = vsub.s32 %v30_v4, %v32_v3  ;;  %v96_v37 = vunpack.c.0.s8 %v95_v36 }
  0x18   :  { %p165_p11 = por %p164_p10, %p163_p9 }
  0x19   :  { %v34_v11 = vrot.slane %v23_v8, %v33_v5  ;;  %v41_v12 = vrot.slane %v27_v10, %v33_v5  ;;  %v51_v15 = vrot.slane %v24_v9, %v33_v5  ;;  %v58_v21 = vrot.slane %v44_v14, %v33_v5 }
  0x1a   :  { %v99_v40 = vsub.s32 %v96_v37, %v32_v3  ;;  %p166_p12 = pnand %p165_p11, %p159_p8 }
  0x1b   :  { %v42_v13 = vcombine.high %v34_v11, %v34_v11  ;;  %v70_v16 = vsel %vm69_vm0, %v34_v11, 0.0  ;;  %v43_v17 = vcombine.high %v41_v12, %v41_v12  ;;  %v73_v19 = vsel %vm69_vm0, %v41_v12, 0.0 }
  0x1c   :  { %v59_v22 = vcombine.high %v51_v15, %v51_v15  ;;  %v77_v25 = vsel %vm69_vm0, %v51_v15, 0.0  ;;  %v60_v27 = vcombine.high %v58_v21, %v58_v21  ;;  %v81_v30 = vsel %vm69_vm0, %v58_v21, 0.0 }
  0x1d   :  { %v71_v18 = vsel %vm69_vm0, %v42_v13, 0.0  ;;  %v75_v23 = vsel %vm69_vm0, %v43_v17, 0.0 }
  0x1e   :  { %v72_v20 = vadd.f32 %v71_v18, %v70_v16  ;;  %v79_v28 = vsel %vm69_vm0, %v59_v22, 0.0  ;;  %v83_v32 = vsel %vm69_vm0, %v60_v27, 0.0 }
  0x20   :  { %v74_v24 = vadd.f32 %v73_v19, %v72_v20 }
  0x22   :  { %v76_v26 = vadd.f32 %v75_v23, %v74_v24 }
  0x24   :  { %v78_v29 = vadd.f32 %v77_v25, %v76_v26 }
  0x26   :  { %v80_v31 = vadd.f32 %v79_v28, %v78_v29 }
  0x28   :  { %v82_v33 = vadd.f32 %v81_v30, %v80_v31 }
  0x2a   :  { %v84_v34 = vadd.f32 %v83_v32, %v82_v33 }
  0x2c   :  { %85 = vadd.xlane.f32.xlu0 %v84_v34 }
  0xb9   :  { %v86_v38 = vpop.xlane.xlu0 %85 }
  0xba   :  { %v87_v39 = vmul.f32 0.0009765625, %v86_v38 }
  0xbc   :  { %v92_v41 = vsub.f32 0.0, %v87_v39  ;;  %v111_v43 = vrot.slane %v87_v39, %v99_v40 }
  0xbe   :  { %v100_v42 = vrot.slane %v92_v41, %v99_v40 }
  0xc0   :  { %v102_v44 = vsel %vm90_vm1, %v100_v42, 0.0  ;;  %v103_v45 = vsel %vm91_vm2, %v100_v42, 0.0 }
  0xc1   :  { %v113_v46 = vsel %vm88_vm3, %v111_v43, %v102_v44  ;;  %v114_v47 = vsel %vm89_vm4, %v111_v43, %v103_v45 }
  0xc2   :  { %115 = vst [vmem:[#allocation5] sm:$0xff] %v113_v46  ;;  %116 = vst [vmem:[#allocation5 + $0x8] sm:$0xff] %v114_v47 }
  0xc3   :  { %169 = shalt.err (!%p166_p12)
}
  0xc4   :  { %s170_s22 = scalar_lea.hbm %s231_s1, 256 }
  0xc5   :  { %p171_p13 = scmp.ne.s32.totalorder %s231_s1, %s170_s22  ;;  %p174_p0 = scmp.lt.u32.totalorder %s170_s22, %s231_s1 }
  0xc7   :  { %p176_p1 = pnand %p174_p0, %p171_p13 }
  0xc9   :  { %179 = shalt.err (!%p176_p1)
}
  0xca   :  { %126 = dma.vmem_to_hbm [thread:$0]  %s124_s18, 256, %s231_s1, [#allocation4]  }
  0xcb   :  { %182 = dma.done.wait [#allocation4], 256  }
  0xcc   :  { %183 = vsyncadd [#allocation4], 4294967040 }
  0xcd   :  { %130 = vsyncpa [#allocation3], 1 }
  0xce   :  { %131 = vsyncpa [#allocation4], 1 }

</bundles_post_ra>
